<compile_context>
chip_gen: v5e
topology: v5e:2x2
jax: 0.10.0
libtpu: 0.0.40
codegen_flags: <defaults>
</compile_context>

<pallas_src>
import jax
import jax.numpy as jnp
from jax.experimental import pallas as pl
from jax.experimental.pallas import tpu as pltpu

# Logical layer widths from the PyTorch module.
H1, H2, H3 = 200, 100, 50
# MXU / lane friendly padded widths (fc4 output rows padded to one bf16
# sublane tile).
H1P, H2P, H3P, H4P = 256, 128, 128, 16


def _round_up(n, m):
    return ((n + m - 1) // m) * m


def critic_kernel(x_ref, w1_ref, b1_ref, w2_ref, b2_ref, w3_ref, b3_ref,
                  w4_ref, out_ref):
    # x_ref: (K, tile_b) bf16, batch on the lane axis.
    # wN_ref: (out_pad, in_pad) bf16 (PyTorch layout); bN_ref: (out_pad, 1) f32.
    # Every dot is canonical (m,k) @ (k,n) -> no transposes anywhere.
    h = jnp.dot(w1_ref[...], x_ref[...],
                preferred_element_type=jnp.float32) + b1_ref[...]
    h = jnp.maximum(h, 0.0).astype(jnp.bfloat16)            # (H1P, tile_b)

    h = jnp.dot(w2_ref[...], h,
                preferred_element_type=jnp.float32) + b2_ref[...]
    h = jnp.maximum(h, 0.0).astype(jnp.bfloat16)            # (H2P, tile_b)

    h = jnp.dot(w3_ref[...], h,
                preferred_element_type=jnp.float32) + b3_ref[...]
    h = jnp.maximum(h, 0.0).astype(jnp.bfloat16)            # (H3P, tile_b)

    q = jnp.dot(w4_ref[...], h,
                preferred_element_type=jnp.float32)          # (H4P, tile_b)
    out_ref[...] = q[0:1, :].astype(out_ref.dtype)           # lane-dense (1, tile_b)


def init_critic_params(key, input_dim, output_dim):
    """PyTorch-style init: U(-1/sqrt(fan_in), 1/sqrt(fan_in)); logical (in,out) layout."""
    dims = [(input_dim + output_dim, H1), (H1, H2), (H2, H3), (H3, 1)]
    params = {}
    for i, (fan_in, fan_out) in enumerate(dims, start=1):
        key, kw, kb = jax.random.split(key, 3)
        bound = 1.0 / jnp.sqrt(float(fan_in))
        params[f"w{i}"] = jax.random.uniform(
            kw, (fan_in, fan_out), jnp.float32, -bound, bound)
        params[f"b{i}"] = jax.random.uniform(
            kb, (1, fan_out), jnp.float32, -bound, bound)
    return params


def pack_critic_params(params):
    """Zero-pad to MXU/lane-friendly widths, PyTorch (out,in) layout, bf16 weights."""
    def pad_w(w, out_pad, in_pad):          # w: (in, out) logical -> (out_pad, in_pad)
        slab = jnp.zeros((out_pad, in_pad), jnp.bfloat16)
        return slab.at[:w.shape[1], :w.shape[0]].set(w.T.astype(jnp.bfloat16))

    def pad_b(b, out_pad):                  # b: (1, out) logical -> (out_pad, 1)
        col = jnp.zeros((out_pad, 1), jnp.float32)
        return col.at[:b.shape[1], 0].set(b[0].astype(jnp.float32))

    k = params["w1"].shape[0]               # input_dim + output_dim (no K padding)
    return {
        "w1": pad_w(params["w1"], H1P, k),   "b1": pad_b(params["b1"], H1P),
        "w2": pad_w(params["w2"], H2P, H1P), "b2": pad_b(params["b2"], H2P),
        "w3": pad_w(params["w3"], H3P, H2P), "b3": pad_b(params["b3"], H3P),
        "w4": pad_w(params["w4"], H4P, H3P),                  # row 0 holds fc4
        "b4": params["b4"].reshape(()).astype(jnp.float32),   # scalar, added in wrapper
    }


def _pick_tile(batch, tile_b):
    """Lane-axis batch tile: multiple of 128, >=2 grid steps when batch is big."""
    tile_b = max(128, _round_up(tile_b, 128))
    tile = min(tile_b, _round_up(batch, 128))
    if batch > 256:
        # keep >= 2 grid steps so the "parallel" axis can use both v7x cores
        tile = min(tile, max(128, _round_up(-(-batch // 2), 128)))
    return max(128, tile)


def critic_forward(state, action, packed, *, tile_b=1024):
    """q = Critic(state, action) using the Pallas kernel. Returns (batch, 1) f32."""
    batch = state.shape[0]
    k = state.shape[1] + action.shape[1]
    assert packed["w1"].shape[1] == k, "packed params do not match input dims"

    tile = _pick_tile(batch, tile_b)
    grid = (pl.cdiv(batch, tile),)   # no batch padding; last block is partial

    # Single fused concat + bf16 cast + transpose: the lane-major kernel wants
    # x as (k, batch) with batch on the lane axis.
    x_t = jnp.concatenate([state, action], axis=1).astype(jnp.bfloat16).T

    def resident(shape):
        # Same block every grid step -> stays VMEM-resident, no re-DMA.
        return pl.BlockSpec(shape, lambda i: (0, 0))

    flops = 2 * batch * (k * H1P + H1P * H2P + H2P * H3P + H3P * H4P)
    bytes_accessed = (
        int(x_t.size) * 2
        + sum(int(packed[n].size) * 2 for n in ("w1", "w2", "w3", "w4"))
        + sum(int(packed[n].size) * 4 for n in ("b1", "b2", "b3"))
        + batch * 4)

    out = pl.pallas_call(
        critic_kernel,
        out_shape=jax.ShapeDtypeStruct((1, batch), jnp.float32),
        grid=grid,
        in_specs=[
            pl.BlockSpec((k, tile), lambda i: (0, i)),   # activations, tiled on lanes
            resident((H1P, k)),   resident((H1P, 1)),
            resident((H2P, H1P)), resident((H2P, 1)),
            resident((H3P, H2P)), resident((H3P, 1)),
            resident((H4P, H3P)),
        ],
        out_specs=pl.BlockSpec((1, tile), lambda i: (0, i)),   # lane-dense output
        compiler_params=pltpu.CompilerParams(
            dimension_semantics=("parallel",)),
        cost_estimate=pl.CostEstimate(
            flops=int(flops), transcendentals=0,
            bytes_accessed=int(bytes_accessed)),
        # NOTE: at tile<=2048 live VMEM is only a few MiB, well under the scoped
        # default; set vmem_limit_bytes here only if tile_b is pushed past ~4096.
    )(x_t, packed["w1"], packed["b1"], packed["w2"], packed["b2"],
      packed["w3"], packed["b3"], packed["w4"])

    # (1, batch) with batch on lanes -> (batch, 1); fc4 bias added here (scalar).
    return out[0].reshape(batch, 1) + packed["b4"]


def critic_reference_f32(state, action, params):
    x = jnp.concatenate([state, action], axis=1)
    x = jnp.maximum(x @ params["w1"] + params["b1"], 0.0)
    x = jnp.maximum(x @ params["w2"] + params["b2"], 0.0)
    x = jnp.maximum(x @ params["w3"] + params["b3"], 0.0)
    return x @ params["w4"] + params["b4"]


def critic_reference_bf16(state, action, params):
    # Matches the kernel's numerics: bf16 operands, f32 accumulation.
    x = jnp.concatenate([state, action], axis=1).astype(jnp.bfloat16)
    for i in (1, 2, 3):
        x = jnp.dot(x, params[f"w{i}"].astype(jnp.bfloat16),
                    preferred_element_type=jnp.float32) + params[f"b{i}"]
        x = jnp.maximum(x, 0.0).astype(jnp.bfloat16)
    return jnp.dot(x, params["w4"].astype(jnp.bfloat16),
                   preferred_element_type=jnp.float32) + params["b4"]


def critic_apply(state, action, params, packed, *, tile_b=1024, min_pallas_batch=64):
    """Dispatch: tiny rollout batches skip pallas_call launch cost entirely."""
    if state.shape[0] < min_pallas_batch:
        return critic_reference_bf16(state, action, params)
    return critic_forward(state, action, packed, tile_b=tile_b)


if __name__ == "__main__":
    input_dim = 8    # state features
    output_dim = 4   # action features

    key = jax.random.PRNGKey(0)
    key, ks, ka, ks2, ka2 = jax.random.split(key, 5)
    params = init_critic_params(key, input_dim, output_dim)
    packed = pack_critic_params(params)

    # --- Small (spec-sized) batch, forced through the Pallas kernel. ---
    state = jax.random.normal(ks, (2, input_dim), jnp.float32)
    action = jax.random.normal(ka, (2, output_dim), jnp.float32)
    q = jax.block_until_ready(critic_forward(state, action, packed))
    assert q.shape == (2, 1)
    q_bf16 = critic_reference_bf16(state, action, params)
    assert jnp.allclose(q, q_bf16, atol=1e-2, rtol=1e-2), (q, q_bf16)
    q_f32 = critic_reference_f32(state, action, params)
    assert jnp.allclose(q, q_f32, atol=1e-1, rtol=1e-1), (q, q_f32)

    # --- Larger batch: 2 grid steps (megacore-splittable) with a partial tail tile. ---
    big = 1000
    state_b = jax.random.normal(ks2, (big, input_dim), jnp.float32)
    action_b = jax.random.normal(ka2, (big, output_dim), jnp.float32)
    q_b = jax.block_until_ready(critic_apply(state_b, action_b, params, packed))
    assert q_b.shape == (big, 1)
    q_b_ref = critic_reference_bf16(state_b, action_b, params)
    assert jnp.allclose(q_b, q_b_ref, atol=1e-2, rtol=1e-2)

    print("KERNEL_OK")
</pallas_src>

<mosaic_0001>
module attributes {stable_mosaic.version = 11 : i64} {
  func.func @critic_kernel(%arg0: i32, %arg1: memref<12x128xbf16, #tpu.memory_space<vmem>>, %arg2: memref<256x12xbf16, #tpu.memory_space<vmem>>, %arg3: memref<256x1xf32, #tpu.memory_space<vmem>>, %arg4: memref<128x256xbf16, #tpu.memory_space<vmem>>, %arg5: memref<128x1xf32, #tpu.memory_space<vmem>>, %arg6: memref<128x128xbf16, #tpu.memory_space<vmem>>, %arg7: memref<128x1xf32, #tpu.memory_space<vmem>>, %arg8: memref<16x128xbf16, #tpu.memory_space<vmem>>, %arg9: memref<1x128xf32, #tpu.memory_space<vmem>>) attributes {dimension_semantics = [#tpu.dimension_semantics<parallel>], iteration_bounds = array<i64: 1>, scalar_prefetch = 0 : i64, scratch_operands = 0 : i64, tpu.core_type = #tpu.core_type<tc>, window_params = [{transform_indices = @transform_0, window_bounds = array<i64: 12, 128>}, {pipeline_mode = #tpu.pipeline_mode<synchronous>, transform_indices = @transform_1, window_bounds = array<i64: 256, 12>}, {pipeline_mode = #tpu.pipeline_mode<synchronous>, transform_indices = @transform_2, window_bounds = array<i64: 256, 1>}, {pipeline_mode = #tpu.pipeline_mode<synchronous>, transform_indices = @transform_3, window_bounds = array<i64: 128, 256>}, {pipeline_mode = #tpu.pipeline_mode<synchronous>, transform_indices = @transform_4, window_bounds = array<i64: 128, 1>}, {pipeline_mode = #tpu.pipeline_mode<synchronous>, transform_indices = @transform_5, window_bounds = array<i64: 128, 128>}, {pipeline_mode = #tpu.pipeline_mode<synchronous>, transform_indices = @transform_6, window_bounds = array<i64: 128, 1>}, {pipeline_mode = #tpu.pipeline_mode<synchronous>, transform_indices = @transform_7, window_bounds = array<i64: 16, 128>}, {transform_indices = @transform_8, window_bounds = array<i64: 1, 128>}]} {
    %c0 = arith.constant 0 : index
    %c0_0 = arith.constant 0 : index
    %0 = vector.load %arg2[%c0, %c0_0] : memref<256x12xbf16, #tpu.memory_space<vmem>>, vector<256x12xbf16>
    %c0_1 = arith.constant 0 : index
    %c0_2 = arith.constant 0 : index
    %1 = vector.load %arg1[%c0_1, %c0_2] : memref<12x128xbf16, #tpu.memory_space<vmem>>, vector<12x128xbf16>
    %cst = arith.constant dense<0.000000e+00> : vector<256x128xf32>
    %2 = tpu.matmul %0, %1, %cst {dimension_numbers = #tpu.dot_dimension_numbers<[1], [0], [0], [1], [0, 0, 1, 1], [], []>} : vector<256x12xbf16>, vector<12x128xbf16>, vector<256x128xf32> -> vector<256x128xf32>
    %c0_3 = arith.constant 0 : index
    %c0_4 = arith.constant 0 : index
    %3 = vector.load %arg3[%c0_3, %c0_4] : memref<256x1xf32, #tpu.memory_space<vmem>>, vector<256x1xf32>
    %4 = vector.broadcast %3 : vector<256x1xf32> to vector<256x128xf32>
    %5 = arith.addf %2, %4 : vector<256x128xf32>
    %cst_5 = arith.constant 0.000000e+00 : f32
    %6 = vector.broadcast %cst_5 : f32 to vector<256x128xf32>
    %7 = arith.maximumf %5, %6 : vector<256x128xf32>
    %8 = arith.truncf %7 : vector<256x128xf32> to vector<256x128xbf16>
    %c0_6 = arith.constant 0 : index
    %c0_7 = arith.constant 0 : index
    %9 = vector.load %arg4[%c0_6, %c0_7] : memref<128x256xbf16, #tpu.memory_space<vmem>>, vector<128x256xbf16>
    %cst_8 = arith.constant dense<0.000000e+00> : vector<128x128xf32>
    %10 = tpu.matmul %9, %8, %cst_8 {dimension_numbers = #tpu.dot_dimension_numbers<[1], [0], [0], [1], [0, 0, 1, 1], [], []>} : vector<128x256xbf16>, vector<256x128xbf16>, vector<128x128xf32> -> vector<128x128xf32>
    %c0_9 = arith.constant 0 : index
    %c0_10 = arith.constant 0 : index
    %11 = vector.load %arg5[%c0_9, %c0_10] : memref<128x1xf32, #tpu.memory_space<vmem>>, vector<128x1xf32>
    %12 = vector.broadcast %11 : vector<128x1xf32> to vector<128x128xf32>
    %13 = arith.addf %10, %12 : vector<128x128xf32>
    %cst_11 = arith.constant 0.000000e+00 : f32
    %14 = vector.broadcast %cst_11 : f32 to vector<128x128xf32>
    %15 = arith.maximumf %13, %14 : vector<128x128xf32>
    %16 = arith.truncf %15 : vector<128x128xf32> to vector<128x128xbf16>
    %c0_12 = arith.constant 0 : index
    %c0_13 = arith.constant 0 : index
    %17 = vector.load %arg6[%c0_12, %c0_13] : memref<128x128xbf16, #tpu.memory_space<vmem>>, vector<128x128xbf16>
    %cst_14 = arith.constant dense<0.000000e+00> : vector<128x128xf32>
    %18 = tpu.matmul %17, %16, %cst_14 {dimension_numbers = #tpu.dot_dimension_numbers<[1], [0], [0], [1], [0, 0, 1, 1], [], []>} : vector<128x128xbf16>, vector<128x128xbf16>, vector<128x128xf32> -> vector<128x128xf32>
    %c0_15 = arith.constant 0 : index
    %c0_16 = arith.constant 0 : index
    %19 = vector.load %arg7[%c0_15, %c0_16] : memref<128x1xf32, #tpu.memory_space<vmem>>, vector<128x1xf32>
    %20 = vector.broadcast %19 : vector<128x1xf32> to vector<128x128xf32>
    %21 = arith.addf %18, %20 : vector<128x128xf32>
    %cst_17 = arith.constant 0.000000e+00 : f32
    %22 = vector.broadcast %cst_17 : f32 to vector<128x128xf32>
    %23 = arith.maximumf %21, %22 : vector<128x128xf32>
    %24 = arith.truncf %23 : vector<128x128xf32> to vector<128x128xbf16>
    %c0_18 = arith.constant 0 : index
    %c0_19 = arith.constant 0 : index
    %25 = vector.load %arg8[%c0_18, %c0_19] : memref<16x128xbf16, #tpu.memory_space<vmem>>, vector<16x128xbf16>
    %cst_20 = arith.constant dense<0.000000e+00> : vector<16x128xf32>
    %26 = tpu.matmul %25, %24, %cst_20 {dimension_numbers = #tpu.dot_dimension_numbers<[1], [0], [0], [1], [0, 0, 1, 1], [], []>} : vector<16x128xbf16>, vector<128x128xbf16>, vector<16x128xf32> -> vector<16x128xf32>
    %27 = vector.extract_strided_slice %26 {offsets = [0, 0], sizes = [1, 128], strides = [1, 1]} : vector<16x128xf32> to vector<1x128xf32>
    %c0_21 = arith.constant 0 : index
    %c0_22 = arith.constant 0 : index
    %28 = vector.load %arg9[%c0_21, %c0_22] : memref<1x128xf32, #tpu.memory_space<vmem>>, vector<1x128xf32>
    tpu.vector_store %arg9[%c0_21, %c0_22], %27 {strides = array<i32>} : memref<1x128xf32, #tpu.memory_space<vmem>>, vector<1x128xf32>,
    return
  }
  func.func @transform_0(%arg0: i32) -> (i32, i32) {
    %c0_i32 = arith.constant 0 : i32
    %c0_i32_0 = arith.constant 0 : i32
    return %c0_i32, %arg0 : i32, i32
  }
  func.func @transform_1(%arg0: i32) -> (i32, i32) {
    %c0_i32 = arith.constant 0 : i32
    %c0_i32_0 = arith.constant 0 : i32
    %c0_i32_1 = arith.constant 0 : i32
    return %c0_i32, %c0_i32_0 : i32, i32
  }
  func.func @transform_2(%arg0: i32) -> (i32, i32) {
    %c0_i32 = arith.constant 0 : i32
    %c0_i32_0 = arith.constant 0 : i32
    %c0_i32_1 = arith.constant 0 : i32
    return %c0_i32, %c0_i32_0 : i32, i32
  }
  func.func @transform_3(%arg0: i32) -> (i32, i32) {
    %c0_i32 = arith.constant 0 : i32
    %c0_i32_0 = arith.constant 0 : i32
    %c0_i32_1 = arith.constant 0 : i32
    return %c0_i32, %c0_i32_0 : i32, i32
  }
  func.func @transform_4(%arg0: i32) -> (i32, i32) {
    %c0_i32 = arith.constant 0 : i32
    %c0_i32_0 = arith.constant 0 : i32
    %c0_i32_1 = arith.constant 0 : i32
    return %c0_i32, %c0_i32_0 : i32, i32
  }
  func.func @transform_5(%arg0: i32) -> (i32, i32) {
    %c0_i32 = arith.constant 0 : i32
    %c0_i32_0 = arith.constant 0 : i32
    %c0_i32_1 = arith.constant 0 : i32
    return %c0_i32, %c0_i32_0 : i32, i32
  }
  func.func @transform_6(%arg0: i32) -> (i32, i32) {
    %c0_i32 = arith.constant 0 : i32
    %c0_i32_0 = arith.constant 0 : i32
    %c0_i32_1 = arith.constant 0 : i32
    return %c0_i32, %c0_i32_0 : i32, i32
  }
  func.func @transform_7(%arg0: i32) -> (i32, i32) {
    %c0_i32 = arith.constant 0 : i32
    %c0_i32_0 = arith.constant 0 : i32
    %c0_i32_1 = arith.constant 0 : i32
    return %c0_i32, %c0_i32_0 : i32, i32
  }
  func.func @transform_8(%arg0: i32) -> (i32, i32) {
    %c0_i32 = arith.constant 0 : i32
    %c0_i32_0 = arith.constant 0 : i32
    return %c0_i32, %arg0 : i32, i32
  }
}

</mosaic_0001>

<bundles_post_ra>
// kernel: tpu_custom_call.1
= control target key start
LH: loop header
LB: loop body
LE: loop exit
PB: predicated region body
PF: predicated region fallthrough
CT: control target
= control target key end

     0   :  { %v1375_v3 = vmov 0   ;;  %vm391_vm0 = vcmask 1045504   ;;  %vm342_vm1 = vcmask 97280   ;;  %s1930_s0 = inlined_call_operand.vmem [shape: bf16[12,2], index: 0, kind: input, shape index: {}]   ;;  %s1931_s1 = inlined_call_operand.vmem [shape: bf16[256,12], index: 1, kind: input, shape index: {}]   ;;  %s1932_s2 = inlined_call_operand.vmem [shape: f32[256,1], index: 2, kind: input, shape index: {}]   ;;  %s1933_s3 = inlined_call_operand.vmem [shape: bf16[128,256], index: 3, kind: input, shape index: {}]   ;;  %s1934_s4 = inlined_call_operand.vmem [shape: f32[128,1], index: 4, kind: input, shape index: {}]   ;;  %s1935_s5 = inlined_call_operand.vmem [shape: bf16[128,128], index: 5, kind: input, shape index: {}]   ;;  %s1936_s6 = inlined_call_operand.vmem [shape: f32[128,1], index: 6, kind: input, shape index: {}]   ;;  %s1937_s7 = inlined_call_operand.vmem [shape: bf16[16,128], index: 7, kind: input, shape index: {}]   ;;  %s1938_s8 = inlined_call_operand.hbm [shape: f32[1,2], index: 8, kind: output, shape index: {}]  }
   0x1   :  { %v95_v0 = vld [vmem:[%s1932_s2 + $0xf0] sm:$0xff]  ;;  %v93_v1 = vld [vmem:[%s1932_s2 + $0xe0] sm:$0xff]  ;;  %1348 = vset.pattern.permute.xlu2 %v1375_v3  ;;  %1347 = vset.pattern.permute.xlu1 %v1375_v3 }
   0x2   :  { %v79_v2 = vld [vmem:[%s1932_s2 + $0x70] sm:$0xff]  ;;  %v1183_v4 = vld [vmem:[%s1930_s0] sm:$0xf]  ;;  %v1317_v5 = vld [vmem:[%s1930_s0] sm:$0x30]  ;;  %1346 = vset.pattern.permute.xlu0 %v1375_v3  ;;  %239 = vperm.xlu2 %1348, %v93_v1  }
   0x3   :  { %v1184_v6 = vor.u32 %v1317_v5, %v1183_v4  ;;  %249 = vperm.xlu0 %1346, %v95_v0   ;;  %169 = vperm.xlu1 %1347, %v79_v2   ;;  %v1301_v8 = vld [vmem:[%s1931_s1] sm:$0xff] }
   0x5   :  { %v393_v7 = vsel %vm391_vm0, %v1184_v6, 0 }
   0x6   :  { %402 = vmatpush.bf16.msra.mxu0 %v393_v7  ;;  %1343 = vmatpush.bf16.msra.mxu2 %v393_v7 }
   0x7   :  { %13 = vsyncpa [#allocation3], 0  ;;  %v94_v9 = vld [vmem:[%s1932_s2 + $0xe8] sm:$0xff]  ;;  %v96_v10 = vld [vmem:[%s1932_s2 + $0xf8] sm:$0xff]  ;;  %s1376_s24 = smov [#allocation2]   ;;  %s1108_s26 = sshll.u32 %s1938_s8, 4  ;;  %s1109_s26 = int_to_ptr.hbm [resolvable:$true] %s1108_s26 }
   0x8   :  { %v80_v11 = vld [vmem:[%s1932_s2 + $0x78] sm:$0xff]  ;;  %v1313_v12 = vld [vmem:[%s1931_s1 + $0x60] sm:$0xff]  ;;  %v91_v13 = vld [vmem:[%s1932_s2 + $0xd0] sm:$0xff] }
   0x9   :  { %1185 = vmatmul.msk.bf16.vlgmr.msra.gmra.mxu0 %vm342_vm1, %v1301_v8  ;;  %1197 = vmatmul.msk.bf16.vlgmr.msra.gmra.mxu2 %vm342_vm1, %v1313_v12  ;;  %v78_v14 = vld [vmem:[%s1932_s2 + $0x68] sm:$0xff]  ;;  %v77_v15 = vld [vmem:[%s1932_s2 + $0x60] sm:$0xff]  ;;  %v76_v17 = vld [vmem:[%s1932_s2 + $0x58] sm:$0xff] }
   0xa   :  { %244 = vperm.xlu2 %1348, %v94_v9   ;;  %v1302_v16 = vld [vmem:[%s1931_s1 + $0x8] sm:$0xff]  ;;  %v92_v18 = vld [vmem:[%s1932_s2 + $0xd8] sm:$0xff]  ;;  %v75_v19 = vld [vmem:[%s1932_s2 + $0x50] sm:$0xff] }
   0xb   :  { %254 = vperm.xlu0 %1346, %v96_v10   ;;  %174 = vperm.xlu1 %1347, %v80_v11   ;;  %v1314_v20 = vld [vmem:[%s1931_s1 + $0x68] sm:$0xff]  ;;  %v73_v21 = vld [vmem:[%s1932_s2 + $0x40] sm:$0xff]  ;;  %v1303_v24 = vld [vmem:[%s1931_s1 + $0x10] sm:$0xff] }
   0xc   :  { %v89_v22 = vld [vmem:[%s1932_s2 + $0xc0] sm:$0xff]  ;;  %v90_v23 = vld [vmem:[%s1932_s2 + $0xc8] sm:$0xff]  ;;  %v88_v25 = vld [vmem:[%s1932_s2 + $0xb8] sm:$0xff] }
   0xd   :  { %v87_v26 = vld [vmem:[%s1932_s2 + $0xb0] sm:$0xff]  ;;  %v74_v27 = vld [vmem:[%s1932_s2 + $0x48] sm:$0xff]  ;;  %v85_v29 = vld [vmem:[%s1932_s2 + $0xa0] sm:$0xff] }
   0xe   :  { %v1315_v28 = vld [vmem:[%s1931_s1 + $0x70] sm:$0xff]  ;;  %v72_v30 = vld [vmem:[%s1932_s2 + $0x38] sm:$0xff]  ;;  %v70_v33 = vld [vmem:[%s1932_s2 + $0x28] sm:$0xff] }
   0xf   :  { %v71_v31 = vld [vmem:[%s1932_s2 + $0x30] sm:$0xff]  ;;  %v1304_v32 = vld [vmem:[%s1931_s1 + $0x18] sm:$0xff]  ;;  %v86_v34 = vld [vmem:[%s1932_s2 + $0xa8] sm:$0xff] }
  0x10   :  { %v69_v35 = vld [vmem:[%s1932_s2 + $0x20] sm:$0xff]  ;;  %v1316_v36 = vld [vmem:[%s1931_s1 + $0x78] sm:$0xff]  ;;  %v67_v37 = vld [vmem:[%s1932_s2 + $0x10] sm:$0xff] }
  0x11   :  { %v83_v38 = vld [vmem:[%s1932_s2 + $0x90] sm:$0xff]  ;;  %v84_v39 = vld [vmem:[%s1932_s2 + $0x98] sm:$0xff]  ;;  %v1305_v40 = vld [vmem:[%s1931_s1 + $0x20] sm:$0xff] }
  0x12   :  { %229 = vperm.xlu2 %1348, %v91_v13   ;;  %v82_v41 = vld [vmem:[%s1932_s2 + $0x88] sm:$0xff]  ;;  %v81_v42 = vld [vmem:[%s1932_s2 + $0x80] sm:$0xff]  ;;  %v68_v43 = vld [vmem:[%s1932_s2 + $0x18] sm:$0xff] }
  0x13   :  { %164 = vperm.xlu1 %1347, %v78_v14   ;;  %159 = vperm.xlu0 %1346, %v77_v15   ;;  %v562_v44 = vld [vmem:[%s1934_s4 + $0x70] sm:$0xff]  ;;  %v66_v45 = vld [vmem:[%s1932_s2 + $0x8] sm:$0xff]  ;;  %v65_v46 = vld [vmem:[%s1932_s2] sm:$0xff] }
  0x14   :  { %v1306_v47 = vld [vmem:[%s1931_s1 + $0x28] sm:$0xff]  ;;  %v560_v49 = vld [vmem:[%s1934_s4 + $0x60] sm:$0xff]  ;;  %v563_v50 = vld [vmem:[%s1934_s4 + $0x78] sm:$0xff] }
  0x15   :  { %v561_v48 = vld [vmem:[%s1934_s4 + $0x68] sm:$0xff]  ;;  %v556_v51 = vld [vmem:[%s1934_s4 + $0x40] sm:$0xff]  ;;  %v559_v52 = vld [vmem:[%s1934_s4 + $0x58] sm:$0xff] }
  0x16   :  { %v558_v53 = vld [vmem:[%s1934_s4 + $0x50] sm:$0xff]  ;;  %v555_v55 = vld [vmem:[%s1934_s4 + $0x38] sm:$0xff]  ;;  %v557_v58 = vld [vmem:[%s1934_s4 + $0x48] sm:$0xff] }
  0x17   :  { %v1307_v54 = vld [vmem:[%s1931_s1 + $0x30] sm:$0xff]  ;;  %v553_v60 = vld [vmem:[%s1934_s4 + $0x28] sm:$0xff]  ;;  %v552_v61 = vld [vmem:[%s1934_s4 + $0x20] sm:$0xff] }
  0x18   :  { %v554_v57 = vld [vmem:[%s1934_s4 + $0x30] sm:$0xff]  ;;  %v1308_v63 = vld [vmem:[%s1931_s1 + $0x38] sm:$0xff]  ;;  %v549_v2 = vld [vmem:[%s1934_s4 + $0x8] sm:$0xff] }
  0x19   :  { %1186 = vmatmul.msk.bf16.gmra.mxu0 %vm342_vm1, %v1302_v16  ;;  %1198 = vmatmul.msk.bf16.gmra.mxu2 %vm342_vm1, %v1314_v20  ;;  %v550_v59 = vld [vmem:[%s1934_s4 + $0x10] sm:$0xff]  ;;  %v548_v3 = vld [vmem:[%s1934_s4] sm:$0xff]  ;;  %v551_v4 = vld [vmem:[%s1934_s4 + $0x18] sm:$0xff] }
  0x1a   :  { %154 = vperm.xlu2 %1348, %v76_v17   ;;  %v874_v8 = vld [vmem:[%s1936_s6 + $0x60] sm:$0xff]  ;;  %v877_v9 = vld [vmem:[%s1936_s6 + $0x78] sm:$0xff]  ;;  %v876_v10 = vld [vmem:[%s1936_s6 + $0x70] sm:$0xff] }
  0x1b   :  { %234 = vperm.xlu0 %1346, %v92_v18   ;;  %149 = vperm.xlu1 %1347, %v75_v19   ;;  %v1309_v11 = vld [vmem:[%s1931_s1 + $0x40] sm:$0xff]  ;;  %v873_v16 = vld [vmem:[%s1936_s6 + $0x58] sm:$0xff]  ;;  %v872_v17 = vld [vmem:[%s1936_s6 + $0x50] sm:$0xff] }
  0x1c   :  { %v875_v18 = vld [vmem:[%s1936_s6 + $0x68] sm:$0xff] }
  0x22   :  { %139 = vperm.xlu2 %1348, %v73_v21  }
  0x23   :  { %219 = vperm.xlu0 %1346, %v89_v22   ;;  %224 = vperm.xlu1 %1347, %v90_v23   ;;  %v868_v22 = vld [vmem:[%s1936_s6 + $0x30] sm:$0xff] }
  0x29   :  { %1187 = vmatmul.msk.bf16.gmra.mxu0 %vm342_vm1, %v1303_v24  ;;  %1199 = vmatmul.msk.bf16.gmra.mxu2 %vm342_vm1, %v1315_v28  ;;  %v871_v24 = vld [vmem:[%s1936_s6 + $0x48] sm:$0xff] }
  0x2a   :  { %214 = vperm.xlu2 %1348, %v88_v25   ;;  %v870_v25 = vld [vmem:[%s1936_s6 + $0x40] sm:$0xff] }
  0x2b   :  { %209 = vperm.xlu1 %1347, %v87_v26   ;;  %144 = vperm.xlu0 %1346, %v74_v27   ;;  %v1310_v27 = vld [vmem:[%s1931_s1 + $0x48] sm:$0xff] }
  0x32   :  { %199 = vperm.xlu2 %1348, %v85_v29  }
  0x33   :  { %134 = vperm.xlu1 %1347, %v72_v30   ;;  %129 = vperm.xlu0 %1346, %v71_v31   ;;  %v867_v31 = vld [vmem:[%s1936_s6 + $0x28] sm:$0xff] }
  0x39   :  { %1188 = vmatmul.msk.bf16.gmra.mxu0 %vm342_vm1, %v1304_v32  ;;  %1200 = vmatmul.msk.bf16.gmra.mxu2 %vm342_vm1, %v1316_v36  ;;  %v866_v32 = vld [vmem:[%s1936_s6 + $0x20] sm:$0xff] }
  0x3a   :  { %124 = vperm.xlu2 %1348, %v70_v33   ;;  %v869_v33 = vld [vmem:[%s1936_s6 + $0x38] sm:$0xff] }
  0x3b   :  { %204 = vperm.xlu0 %1346, %v86_v34   ;;  %119 = vperm.xlu1 %1347, %v69_v35  }
  0x42   :  { %109 = vperm.xlu2 %1348, %v67_v37  }
  0x43   :  { %189 = vperm.xlu0 %1346, %v83_v38   ;;  %194 = vperm.xlu1 %1347, %v84_v39   ;;  %v862_v39 = vld [vmem:[%s1936_s6] sm:$0xff] }
  0x49   :  { %1189 = vmatmul.msk.bf16.gmra.mxu0 %vm342_vm1, %v1305_v40  ;;  %v865_v40 = vld [vmem:[%s1936_s6 + $0x18] sm:$0xff] }
  0x4a   :  { %184 = vperm.xlu2 %1348, %v82_v41   ;;  %v864_v41 = vld [vmem:[%s1936_s6 + $0x10] sm:$0xff] }
  0x4b   :  { %179 = vperm.xlu1 %1347, %v81_v42   ;;  %114 = vperm.xlu0 %1346, %v68_v43  }
  0x52   :  { %636 = vperm.xlu2 %1348, %v562_v44   ;;  %v1311_v44 = vld [vmem:[%s1931_s1 + $0x50] sm:$0xff] }
  0x53   :  { %104 = vperm.xlu1 %1347, %v66_v45   ;;  %99 = vperm.xlu0 %1346, %v65_v46  }
  0x59   :  { %1190 = vmatmul.msk.bf16.gmra.mxu0 %vm342_vm1, %v1306_v47 }
  0x5a   :  { %631 = vperm.xlu2 %1348, %v561_v48   ;;  %v863_v48 = vld [vmem:[%s1936_s6 + $0x8] sm:$0xff] }
  0x5b   :  { %626 = vperm.xlu1 %1347, %v560_v49   ;;  %641 = vperm.xlu0 %1346, %v563_v50  }
  0x5c   :  { %v1591_v56 = vpop.permute.xlu2 %239 }
  0x62   :  { %606 = vperm.xlu2 %1348, %v556_v51  }
  0x63   :  { %621 = vperm.xlu1 %1347, %v559_v52   ;;  %616 = vperm.xlu0 %1346, %v558_v53  }
  0x64   :  { %v1609_v62 = vpop.permute.xlu2 %244 }
  0x69   :  { %1191 = vmatmul.msk.bf16.gmra.mxu0 %vm342_vm1, %v1307_v54 }
  0x6a   :  { %601 = vperm.xlu2 %1348, %v555_v55  }
  0x6b   :  { %596 = vperm.xlu1 %1347, %v554_v57   ;;  %611 = vperm.xlu0 %1346, %v557_v58  }
  0x6c   :  { %v1628_v5 = vpop.permute.xlu2 %229 }
  0x72   :  { %576 = vperm.xlu2 %1348, %v550_v59  }
  0x73   :  { %591 = vperm.xlu1 %1347, %v553_v60   ;;  %586 = vperm.xlu0 %1346, %v552_v61   ;;  %v1312_v61 = vld [vmem:[%s1931_s1 + $0x58] sm:$0xff]  ;;  %s1106_s1 = sshll.u32 %s1376_s24, 4  ;;  %s1107_s1 = int_to_ptr.vmem [resolvable:$true] %s1106_s1 }
  0x74   :  { %v1650_v14 = vpop.permute.xlu2 %154 }
  0x75   :  { %v1614_v0 = vpop.permute.xlu0 %249  ;;  %v1616_v1 = vpop.permute.xlu1 %169 }
  0x79   :  { %1192 = vmatmul.msk.bf16.gmra.mxu0 %vm342_vm1, %v1308_v63 }
  0x7a   :  { %571 = vperm.xlu2 %1348, %v549_v2  }
  0x7b   :  { %566 = vperm.xlu1 %1347, %v548_v3   ;;  %581 = vperm.xlu0 %1346, %v551_v4  }
  0x7c   :  { %v1673_v23 = vpop.permute.xlu2 %139 }
  0x7d   :  { %v1630_v6 = vpop.permute.xlu0 %254  ;;  %v1632_v7 = vpop.permute.xlu1 %174 }
  0x82   :  { %940 = vperm.xlu2 %1348, %v874_v8  }
  0x83   :  { %955 = vperm.xlu1 %1347, %v877_v9   ;;  %950 = vperm.xlu0 %1346, %v876_v10  }
  0x84   :  { %v1702_v35 = vpop.permute.xlu2 %214 }
  0x85   :  { %v1646_v12 = vpop.permute.xlu1 %164  ;;  %v1648_v13 = vpop.permute.xlu0 %159 }
  0x86   :  { %v1652_v15 = vpop.f32.mrf.mxu0 }
  0x89   :  { %1193 = vmatmul.msk.bf16.gmra.mxu0 %vm342_vm1, %v1309_v11 }
  0x8a   :  { %935 = vperm.xlu2 %1348, %v873_v16  }
  0x8b   :  { %930 = vperm.xlu1 %1347, %v872_v17   ;;  %945 = vperm.xlu0 %1346, %v875_v18  }
  0x8c   :  { %v1681_v26 = vpop.f32.mrf.mxu2  ;;  %v1717_v43 = vpop.permute.xlu2 %199 }
  0x8d   :  { %v1664_v19 = vpop.permute.xlu0 %234  ;;  %v1666_v20 = vpop.permute.xlu1 %149 }
  0x8e   :  { %v1668_v21 = vpop.f32.mrf.mxu0 }
  0x92   :  { %910 = vperm.xlu2 %1348, %v868_v22  }
  0x93   :  { %925 = vperm.xlu1 %1347, %v871_v24   ;;  %920 = vperm.xlu0 %1346, %v870_v25  }
  0x94   :  { %v1700_v34 = vpop.f32.mrf.mxu2  ;;  %v125_v52 = vpop.permute.xlu2 %124 }
  0x95   :  { %v1686_v28 = vpop.permute.xlu0 %219  ;;  %v1688_v29 = vpop.permute.xlu1 %224 }
  0x96   :  { %v409_v30 = vpop.f32.mrf.mxu0 }
  0x99   :  { %1194 = vmatmul.msk.bf16.gmra.mxu0 %vm342_vm1, %v1310_v27 }
  0x9a   :  { %905 = vperm.xlu2 %1348, %v867_v31  }
  0x9b   :  { %900 = vperm.xlu1 %1347, %v866_v32   ;;  %915 = vperm.xlu0 %1346, %v869_v33  }
  0x9c   :  { %v469_v42 = vpop.f32.mrf.mxu2  ;;  %v110_v4 = vpop.permute.xlu2 %109 }
  0x9d   :  { %v1704_v36 = vpop.permute.xlu1 %209  ;;  %v1706_v37 = vpop.permute.xlu0 %144  ;;  %v410_v9 = vadd.f32 %v409_v30, %v110_v4  ;;  %v465_v4 = vadd.f32 %v1681_v26, %v1686_v28 }
  0x9e   :  { %v411_v38 = vpop.f32.mrf.mxu0 }
  0x9f   :  { %v486_v24 = vmax.f32 %v410_v9, 0.0 }
  0xa2   :  { %880 = vperm.xlu2 %1348, %v862_v39  }
  0xa3   :  { %895 = vperm.xlu1 %1347, %v865_v40   ;;  %890 = vperm.xlu0 %1346, %v864_v41  }
  0xa4   :  { %v471_v49 = vpop.f32.mrf.mxu2 }
  0xa5   :  { %v135_v45 = vpop.permute.xlu1 %134  ;;  %v130_v46 = vpop.permute.xlu0 %129 }
  0xa6   :  { %v414_v47 = vpop.f32.mrf.mxu0 }
  0xa9   :  { %1195 = vmatmul.msk.bf16.gmra.mxu0 %vm342_vm1, %v1311_v44 }
  0xab   :  { %885 = vperm.xlu0 %1346, %v863_v48  }
  0xac   :  { %v474_v59 = vpop.f32.mrf.mxu2 }
  0xad   :  { %v1726_v50 = vpop.permute.xlu0 %204  ;;  %v120_v51 = vpop.permute.xlu1 %119  ;;  %v475_v48 = vadd.f32 %v474_v59, %v1591_v56  ;;  %v467_v56 = vadd.f32 %v1700_v34, %v1688_v29 }
  0xae   :  { %v415_v53 = vadd.f32 %v414_v47, %v120_v51  ;;  %v416_v54 = vpop.f32.mrf.mxu0 }
  0xaf   :  { %v417_v55 = vadd.f32 %v416_v54, %v125_v52  ;;  %v509_v9 = vmax.f32 %v467_v56, 0.0 }
  0xb0   :  { %v488_v57 = vmax.f32 %v415_v53, 0.0 }
  0xb1   :  { %v489_v58 = vmax.f32 %v417_v55, 0.0 }
  0xb3   :  { %v1728_v60 = vpack.c.bf16 %v489_v58, %v488_v57  ;;  %v512_v58 = vmax.f32 %v475_v48, 0.0 }
  0xb4   :  { %v476_v8 = vpop.f32.mrf.mxu2 }
  0xb5   :  { %v1733_v63 = vpop.permute.xlu0 %189  ;;  %v1735_v2 = vpop.permute.xlu1 %194  ;;  %v477_v51 = vadd.f32 %v476_v8, %v1609_v62  ;;  %v508_v8 = vmax.f32 %v465_v4, 0.0 }
  0xb6   :  { %v419_v3 = vpop.f32.mrf.mxu0 }
  0xb7   :  { %v420_v10 = vadd.f32 %v419_v3, %v130_v46  ;;  %v472_v3 = vadd.f32 %v471_v49, %v1664_v19 }
  0xb9   :  { %1196 = vmatmul.msk.bf16.gmra.mxu0 %vm342_vm1, %v1312_v61  ;;  %v490_v27 = vmax.f32 %v420_v10, 0.0  ;;  %v513_v61 = vmax.f32 %v477_v51, 0.0  ;;  %v511_v59 = vmax.f32 %v472_v3, 0.0 }
  0xbb   :  { %v530_v62 = vpack.c.bf16 %v513_v61, %v512_v58 }
  0xbc   :  { %v479_v32 = vpop.f32.mrf.mxu2 }
  0xbd   :  { %v1738_v11 = vpop.permute.xlu1 %179  ;;  %v115_v16 = vpop.permute.xlu0 %114 }
  0xbe   :  { %v412_v17 = vadd.f32 %v411_v38, %v115_v16  ;;  %v421_v18 = vpop.f32.mrf.mxu0  ;;  %v480_v38 = vadd.f32 %v479_v32, %v1614_v0 }
  0xbf   :  { %v422_v22 = vadd.f32 %v421_v18, %v135_v45 }
  0xc0   :  { %v487_v25 = vmax.f32 %v412_v17, 0.0  ;;  %v514_v55 = vmax.f32 %v480_v38, 0.0 }
  0xc1   :  { %v491_v31 = vmax.f32 %v422_v22, 0.0 }
  0xc2   :  { %v1740_v33 = vpack.c.bf16 %v487_v25, %v486_v24 }
  0xc3   :  { %v1742_v39 = vpack.c.bf16 %v491_v31, %v490_v27 }
  0xc4   :  { %v481_v52 = vpop.f32.mrf.mxu2 }
  0xc5   :  { %v105_v40 = vpop.permute.xlu1 %104  ;;  %v100_v41 = vpop.permute.xlu0 %99  ;;  %v482_v53 = vadd.f32 %v481_v52, %v1630_v6 }
  0xc6   :  { %v407_v30 = vadd.f32 %v1668_v21, %v105_v40  ;;  %v405_v44 = vadd.f32 %v1652_v15, %v100_v41  ;;  %v424_v46 = vpop.f32.mrf.mxu0  ;;  %v470_v15 = vadd.f32 %v469_v42, %v1628_v5  ;;  %v528_v5 = vpack.c.bf16 %v509_v9, %v508_v8  ;;  %v185_v8 = vpop.permute.xlu2 %184 }
  0xc7   :  { %v515_v57 = vmax.f32 %v482_v53, 0.0 }
  0xc8   :  { %v485_v47 = vmax.f32 %v407_v30, 0.0  ;;  %v484_v45 = vmax.f32 %v405_v44, 0.0  ;;  %v510_v6 = vmax.f32 %v470_v15, 0.0 }
  0xc9   :  { %v531_v0 = vpack.c.bf16 %v515_v57, %v514_v55  ;;  %v1323_v57 = vld [vmem:[%s1933_s3 + $0x24] sm:$0xf0] }
  0xca   :  { %v516_v54 = vpack.c.bf16 %v485_v47, %v484_v45  ;;  %v529_v16 = vpack.c.bf16 %v511_v59, %v510_v6 }
  0xcb   :  { %773 = vmatpush.bf16.msrb.mxu2 %v531_v0 }
  0xce   :  { %v426_v21 = vpop.f32.mrf.mxu0 }
  0xcf   :  { %774 = vmatpush.bf16.msrb.mxu2 %v530_v62 }
  0xd3   :  { %775 = vmatpush.bf16.msrb.mxu2 %v529_v16 }
  0xd6   :  { %v429_v10 = vpop.f32.mrf.mxu0 }
  0xd7   :  { %776 = vmatpush.bf16.msrb.mxu2 %v528_v5  ;;  %v430_v32 = vadd.f32 %v429_v10, %v1666_v20 }
  0xde   :  { %v431_v19 = vpop.f32.mrf.mxu0 }
  0xdf   :  { %v432_v25 = vadd.f32 %v431_v19, %v1650_v14 }
  0xe1   :  { %v495_v30 = vmax.f32 %v432_v25, 0.0  ;;  %v1243_v25 = vld [vmem:[%s1933_s3 + $0x50] sm:$0xf] }
  0xe6   :  { %v434_v42 = vpop.f32.mrf.mxu0 }
  0xe7   :  { %v435_v18 = vadd.f32 %v434_v42, %v1648_v13  ;;  %v1318_v42 = vld [vmem:[%s1933_s3 + $0x4] sm:$0xf] }
  0xe9   :  { %v496_v40 = vmax.f32 %v435_v18, 0.0  ;;  %v1213_v18 = vld [vmem:[%s1933_s3 + $0x18] sm:$0xf0] }
  0xee   :  { %v436_v49 = vpop.f32.mrf.mxu0 }
  0xef   :  { %v437_v29 = vadd.f32 %v436_v49, %v1646_v12  ;;  %v425_v12 = vadd.f32 %v424_v46, %v1673_v23  ;;  %v1203_v23 = vld [vmem:[%s1933_s3] sm:$0xf] }
  0xf1   :  { %v497_v27 = vmax.f32 %v437_v29, 0.0  ;;  %v492_v47 = vmax.f32 %v425_v12, 0.0  ;;  %v1327_v29 = vld [vmem:[%s1933_s3 + $0x44] sm:$0xf0]  ;;  %v1229_v12 = vld [vmem:[%s1933_s3 + $0x38] sm:$0xf0] }
  0xf3   :  { %v522_v44 = vpack.c.bf16 %v497_v27, %v496_v40  ;;  %v1329_v27 = vld [vmem:[%s1933_s3 + $0x54] sm:$0xf0] }
  0xf4   :  { %v1244_v40 = vor.u32 %v1329_v27, %v1243_v25 }
  0xf6   :  { %v439_v17 = vpop.f32.mrf.mxu0 }
  0xf7   :  { %v440_v26 = vadd.f32 %v439_v17, %v1616_v1  ;;  %v427_v1 = vadd.f32 %v426_v21, %v1706_v37  ;;  %v1319_v37 = vld [vmem:[%s1933_s3 + $0x4] sm:$0xf0] }
  0xf8   :  { %v1204_v48 = vor.u32 %v1319_v37, %v1203_v23  ;;  %v1328_v37 = vld [vmem:[%s1933_s3 + $0x54] sm:$0xf] }
  0xf9   :  { %v498_v22 = vmax.f32 %v440_v26, 0.0  ;;  %v493_v13 = vmax.f32 %v427_v1, 0.0  ;;  %v1251_v1 = vld [vmem:[%s1933_s3 + $0x60] sm:$0xf] }
  0xfb   :  { %v520_v45 = vpack.c.bf16 %v493_v13, %v492_v47  ;;  %v1333_v47 = vld [vmem:[%s1933_s3 + $0x74] sm:$0xf0] }
  0xfe   :  { %v441_v28 = vpop.f32.mrf.mxu0 }
  0xff   :  { %v442_v34 = vadd.f32 %v441_v28, %v1632_v7  ;;  %v494_v7 = vmax.f32 %v430_v32, 0.0  ;;  %v1235_v28 = vld [vmem:[%s1933_s3 + $0x40] sm:$0xf]  ;;  %v1221_v32 = vld [vmem:[%s1933_s3 + $0x28] sm:$0xf0] }
 0x101   :  { %v499_v24 = vmax.f32 %v442_v34, 0.0  ;;  %v521_v38 = vpack.c.bf16 %v495_v30, %v494_v7  ;;  %v1320_v34 = vld [vmem:[%s1933_s3 + $0x14] sm:$0xf]  ;;  %v1331_v30 = vld [vmem:[%s1933_s3 + $0x64] sm:$0xf0] }
 0x102   :  { %v1252_v7 = vor.u32 %v1331_v30, %v1251_v1 }
 0x103   :  { %v523_v31 = vpack.c.bf16 %v499_v24, %v498_v22  ;;  %v1236_v22 = vor.u32 %v1327_v29, %v1235_v28  ;;  %v1216_v24 = vor.u32 %v1320_v34, %v1213_v18 }
 0x105   :  { %724 = vmatpush.bf16.msra.mxu1 %v523_v31  ;;  %v1322_v31 = vld [vmem:[%s1933_s3 + $0x24] sm:$0xf] }
 0x106   :  { %v444_v41 = vpop.f32.mrf.mxu0 }
 0x109   :  { %725 = vmatpush.bf16.msra.mxu1 %v522_v44  ;;  %v1324_v44 = vld [vmem:[%s1933_s3 + $0x34] sm:$0xf] }
 0x10a   :  { %v1232_v13 = vor.u32 %v1324_v44, %v1229_v12 }
 0x10d   :  { %726 = vmatpush.bf16.msra.mxu1 %v521_v38  ;;  %v1259_v38 = vld [vmem:[%s1933_s3 + $0x70] sm:$0xf] }
 0x10e   :  { %v446_v14 = vpop.f32.mrf.mxu0 }
 0x10f   :  { %v447_v9 = vadd.f32 %v446_v14, %v185_v8  ;;  %v1326_v14 = vld [vmem:[%s1933_s3 + $0x44] sm:$0xf] }
 0x111   :  { %727 = vmatpush.bf16.msra.mxu1 %v520_v45  ;;  %v1237_v45 = vld [vmem:[%s1933_s3 + $0x48] sm:$0xf0] }
 0x112   :  { %v1240_v23 = vor.u32 %v1326_v14, %v1237_v45 }
 0x115   :  { %728 = vmatpush.bf16.msra.mxu1 %v1742_v39  ;;  %v1211_v39 = vld [vmem:[%s1933_s3 + $0x10] sm:$0xf] }
 0x116   :  { %v449_v20 = vpop.f32.mrf.mxu0 }
 0x117   :  { %v450_v6 = vadd.f32 %v449_v20, %v1733_v63  ;;  %v1325_v63 = vld [vmem:[%s1933_s3 + $0x34] sm:$0xf0]  ;;  %v1260_v20 = vor.u32 %v1333_v47, %v1259_v38 }
 0x119   :  { %729 = vmatpush.bf16.msra.mxu1 %v1728_v60  ;;  %v1321_v60 = vld [vmem:[%s1933_s3 + $0x14] sm:$0xf0]  ;;  %v502_v16 = vmax.f32 %v450_v6, 0.0 }
 0x11a   :  { %v1212_v52 = vor.u32 %v1321_v60, %v1211_v39  ;;  %v1860_v39 = vpop.permute.xlu1 %626  ;;  %v1330_v60 = vld [vmem:[%s1933_s3 + $0x64] sm:$0xf] }
 0x11d   :  { %730 = vmatpush.bf16.msra.mxu1 %v1740_v33 }
 0x11e   :  { %v451_v46 = vpop.f32.mrf.mxu0 }
 0x121   :  { %731 = vmatpush.bf16.msra.mxu1 %v516_v54  ;;  %v1219_v54 = vld [vmem:[%s1933_s3 + $0x20] sm:$0xf] }
 0x122   :  { %v1220_v15 = vor.u32 %v1323_v57, %v1219_v54  ;;  %v1870_v54 = vpop.permute.xlu1 %621  ;;  %v1332_v57 = vld [vmem:[%s1933_s3 + $0x74] sm:$0xf] }
 0x124   :  { %732 = vmatmul.bf16.vlgmr.msra.gmra.mxu1 %v1204_v48 }
 0x126   :  { %v454_v51 = vpop.f32.mrf.mxu0 }
 0x127   :  { %v455_v3 = vadd.f32 %v454_v51, %v1717_v43  ;;  %v501_v43 = vmax.f32 %v447_v9, 0.0  ;;  %v1858_v51 = vpop.permute.xlu2 %636 }
 0x129   :  { %v504_v59 = vmax.f32 %v455_v3, 0.0 }
 0x12a   :  { %v597_v3 = vpop.permute.xlu1 %596 }
 0x12e   :  { %v456_v33 = vpop.f32.mrf.mxu0 }
 0x12f   :  { %v457_v61 = vadd.f32 %v456_v33, %v1726_v50  ;;  %v1253_v33 = vld [vmem:[%s1933_s3 + $0x68] sm:$0xf0] }
 0x131   :  { %v505_v56 = vmax.f32 %v457_v61, 0.0 }
 0x133   :  { %v526_v50 = vpack.c.bf16 %v505_v56, %v504_v59  ;;  %v592_v56 = vpop.permute.xlu1 %591 }
 0x134   :  { %737 = vmatmul.bf16.gmra.mxu1 %v1212_v52  ;;  %v1256_v52 = vor.u32 %v1330_v60, %v1253_v33 }
 0x136   :  { %v459_v53 = vpop.f32.mrf.mxu0 }
 0x137   :  { %v460_v55 = vadd.f32 %v459_v53, %v1704_v36  ;;  %v452_v36 = vadd.f32 %v451_v46, %v1735_v2  ;;  %v1227_v2 = vld [vmem:[%s1933_s3 + $0x30] sm:$0xf]  ;;  %v1245_v46 = vld [vmem:[%s1933_s3 + $0x58] sm:$0xf0]  ;;  %v1868_v53 = vpop.permute.xlu2 %631 }
 0x138   :  { %v1228_v17 = vor.u32 %v1325_v63, %v1227_v2  ;;  %v1248_v48 = vor.u32 %v1328_v37, %v1245_v46 }
 0x139   :  { %v506_v0 = vmax.f32 %v460_v55, 0.0  ;;  %v503_v10 = vmax.f32 %v452_v36, 0.0 }
 0x13b   :  { %v525_v5 = vpack.c.bf16 %v503_v10, %v502_v16  ;;  %v567_v8 = vpop.permute.xlu1 %566 }
 0x13e   :  { %v461_v58 = vpop.f32.mrf.mxu0 }
 0x13f   :  { %v462_v21 = vadd.f32 %v461_v58, %v1702_v35  ;;  %v445_v35 = vadd.f32 %v444_v41, %v1738_v11  ;;  %v1205_v11 = vld [vmem:[%s1933_s3 + $0x8] sm:$0xf0]  ;;  %v1224_v41 = vor.u32 %v1322_v31, %v1221_v32  ;;  %v1261_v58 = vld [vmem:[%s1933_s3 + $0x78] sm:$0xf0]  ;;  %v607_v61 = vpop.permute.xlu2 %606 }
 0x140   :  { %v1208_v26 = vor.u32 %v1318_v42, %v1205_v11 }
 0x141   :  { %v507_v4 = vmax.f32 %v462_v21, 0.0  ;;  %v500_v19 = vmax.f32 %v445_v35, 0.0 }
 0x143   :  { %v527_v62 = vpack.c.bf16 %v507_v4, %v506_v0  ;;  %v524_v49 = vpack.c.bf16 %v501_v43, %v500_v19  ;;  %v1878_v0 = vpop.permute.xlu0 %641 }
 0x144   :  { %742 = vmatmul.bf16.gmra.mxu1 %v1220_v15  ;;  %v1264_v15 = vor.u32 %v1332_v57, %v1261_v58 }
 0x145   :  { %777 = vmatpush.bf16.msrb.mxu2 %v527_v62 }
 0x147   :  { %v602_v4 = vpop.permute.xlu2 %601 }
 0x149   :  { %778 = vmatpush.bf16.msrb.mxu2 %v526_v50 }
 0x14b   :  { %v1880_v62 = vpop.permute.xlu0 %616 }
 0x14d   :  { %779 = vmatpush.bf16.msrb.mxu2 %v525_v5 }
 0x14f   :  { %v577_v6 = vpop.permute.xlu2 %576 }
 0x151   :  { %780 = vmatpush.bf16.msrb.mxu2 %v524_v49 }
 0x153   :  { %v1882_v35 = vpop.permute.xlu0 %611 }
 0x154   :  { %747 = vmatmul.bf16.gmra.mxu1 %v1228_v17  ;;  %781 = vmatmul.bf16.vlgmr.msrb.gmra.mxu2 %v1208_v26 }
 0x157   :  { %v572_v16 = vpop.permute.xlu2 %571 }
 0x15b   :  { %v587_v11 = vpop.permute.xlu0 %586 }
 0x163   :  { %v582_v34 = vpop.permute.xlu0 %581 }
 0x164   :  { %752 = vmatmul.bf16.gmra.mxu1 %v1236_v22  ;;  %786 = vmatmul.bf16.gmra.mxu2 %v1216_v24 }
 0x174   :  { %757 = vmatmul.bf16.gmra.mxu1 %v1244_v40  ;;  %791 = vmatmul.bf16.gmra.mxu2 %v1224_v41 }
 0x184   :  { %762 = vmatmul.bf16.gmra.mxu1 %v1252_v7  ;;  %796 = vmatmul.bf16.gmra.mxu2 %v1232_v13 }
 0x194   :  { %767 = vmatmul.bf16.gmra.mxu1 %v1260_v20  ;;  %801 = vmatmul.bf16.gmra.mxu2 %v1240_v23 }
 0x1a1   :  { %v733_v55 = vpop.f32.mrf.mxu1 }
 0x1a2   :  { %v734_v9 = vadd.f32 %v733_v55, %v567_v8 }
 0x1a4   :  { %806 = vmatmul.bf16.gmra.mxu2 %v1248_v48 }
 0x1a9   :  { %v735_v21 = vpop.f32.mrf.mxu1 }
 0x1aa   :  { %v736_v5 = vadd.f32 %v735_v21, %v572_v16 }
 0x1b1   :  { %v738_v36 = vpop.f32.mrf.mxu1 }
 0x1b2   :  { %v739_v17 = vadd.f32 %v738_v36, %v577_v6 }
 0x1b4   :  { %811 = vmatmul.bf16.gmra.mxu2 %v1256_v52 }
 0x1b9   :  { %v740_v59 = vpop.f32.mrf.mxu1 }
 0x1ba   :  { %v741_v18 = vadd.f32 %v740_v59, %v582_v34 }
 0x1c1   :  { %v743_v43 = vpop.f32.mrf.mxu1 }
 0x1c2   :  { %v744_v40 = vadd.f32 %v743_v43, %v587_v11 }
 0x1c4   :  { %816 = vmatmul.bf16.gmra.mxu2 %v1264_v15 }
 0x1c9   :  { %v745_v26 = vpop.f32.mrf.mxu1 }
 0x1ca   :  { %v746_v44 = vadd.f32 %v745_v26, %v592_v56 }
 0x1d1   :  { %v748_v25 = vpop.f32.mrf.mxu1 }
 0x1d2   :  { %v749_v45 = vadd.f32 %v748_v25, %v597_v3 }
 0x1d7   :  { %v782_v10 = vpop.f32.mrf.mxu2 }
 0x1d8   :  { %v783_v50 = vadd.f32 %v782_v10, %v734_v9 }
 0x1d9   :  { %v750_v30 = vpop.f32.mrf.mxu1 }
 0x1da   :  { %v822_v63 = vmax.f32 %v783_v50, 0.0  ;;  %v751_v37 = vadd.f32 %v750_v30, %v602_v4  ;;  %v1336_v30 = vld [vmem:[%s1935_s5 + $0x10] sm:$0xff] }
 0x1df   :  { %v784_v19 = vpop.f32.mrf.mxu2 }
 0x1e0   :  { %v785_v2 = vadd.f32 %v784_v19, %v736_v5 }
 0x1e1   :  { %v753_v14 = vpop.f32.mrf.mxu1 }
 0x1e2   :  { %v823_v42 = vmax.f32 %v785_v2, 0.0  ;;  %v754_v57 = vadd.f32 %v753_v14, %v607_v61  ;;  %v1341_v14 = vld [vmem:[%s1935_s5 + $0x38] sm:$0xff] }
 0x1e4   :  { %v1884_v49 = vpack.c.bf16 %v823_v42, %v822_v63 }
 0x1e7   :  { %v787_v28 = vpop.f32.mrf.mxu2 }
 0x1e8   :  { %v788_v29 = vadd.f32 %v787_v28, %v739_v17 }
 0x1e9   :  { %v755_v46 = vpop.f32.mrf.mxu1 }
 0x1ea   :  { %v824_v27 = vmax.f32 %v788_v29, 0.0 }
 0x1ef   :  { %v789_v22 = vpop.f32.mrf.mxu2 }
 0x1f0   :  { %v790_v24 = vadd.f32 %v789_v22, %v741_v18 }
 0x1f1   :  { %v758_v15 = vpop.f32.mrf.mxu1 }
 0x1f2   :  { %v825_v31 = vmax.f32 %v790_v24, 0.0  ;;  %v759_v34 = vadd.f32 %v758_v15, %v1880_v62  ;;  %v1334_v62 = vld [vmem:[%s1935_s5] sm:$0xff] }
 0x1f4   :  { %v1886_v32 = vpack.c.bf16 %v825_v31, %v824_v27 }
 0x1f7   :  { %v792_v41 = vpop.f32.mrf.mxu2 }
 0x1f8   :  { %v793_v1 = vadd.f32 %v792_v41, %v744_v40 }
 0x1f9   :  { %v760_v56 = vpop.f32.mrf.mxu1 }
 0x1fa   :  { %v826_v13 = vmax.f32 %v793_v1, 0.0  ;;  %v761_v17 = vadd.f32 %v760_v56, %v1870_v54 }
 0x1ff   :  { %v794_v12 = vpop.f32.mrf.mxu2 }
 0x200   :  { %v795_v7 = vadd.f32 %v794_v12, %v746_v44  ;;  %v1339_v44 = vld [vmem:[%s1935_s5 + $0x28] sm:$0xff]  ;;  %v951_v12 = vpop.permute.xlu0 %950 }
 0x201   :  { %v763_v59 = vpop.f32.mrf.mxu1 }
 0x202   :  { %v827_v38 = vmax.f32 %v795_v7, 0.0  ;;  %v764_v63 = vadd.f32 %v763_v59, %v1860_v39  ;;  %v1340_v7 = vld [vmem:[%s1935_s5 + $0x30] sm:$0xff] }
 0x204   :  { %v840_v47 = vpack.c.bf16 %v827_v38, %v826_v13  ;;  %v941_v13 = vpop.permute.xlu2 %940 }
 0x207   :  { %v797_v20 = vpop.f32.mrf.mxu2 }
 0x208   :  { %v798_v23 = vadd.f32 %v797_v20, %v749_v45  ;;  %v946_v38 = vpop.permute.xlu0 %945  ;;  %v956_v20 = vpop.permute.xlu1 %955 }
 0x209   :  { %v765_v9 = vpop.f32.mrf.mxu1 }
 0x20a   :  { %v828_v33 = vmax.f32 %v798_v23, 0.0  ;;  %v766_v5 = vadd.f32 %v765_v9, %v1868_v53  ;;  %v756_v53 = vadd.f32 %v755_v46, %v1882_v35  ;;  %v1335_v35 = vld [vmem:[%s1935_s5 + $0x8] sm:$0xff] }
 0x20f   :  { %v799_v48 = vpop.f32.mrf.mxu2 }
 0x210   :  { %v800_v60 = vadd.f32 %v799_v48, %v751_v37  ;;  %v1921_v45 = vpop.permute.xlu0 %920  ;;  %v931_v46 = vpop.permute.xlu1 %930 }
 0x211   :  { %v768_v50 = vpop.f32.mrf.mxu1 }
 0x212   :  { %v829_v52 = vmax.f32 %v800_v60, 0.0  ;;  %v769_v43 = vadd.f32 %v768_v50, %v1858_v51 }
 0x214   :  { %v841_v55 = vpack.c.bf16 %v829_v52, %v828_v33 }
 0x217   :  { %v802_v58 = vpop.f32.mrf.mxu2 }
 0x218   :  { %v803_v21 = vadd.f32 %v802_v58, %v754_v57  ;;  %v916_v37 = vpop.permute.xlu0 %915  ;;  %v926_v52 = vpop.permute.xlu1 %925 }
 0x219   :  { %v770_v16 = vpop.f32.mrf.mxu1 }
 0x21a   :  { %v771_v61 = vadd.f32 %v770_v16, %v1878_v0  ;;  %v830_v41 = vmax.f32 %v803_v21, 0.0 }
 0x21f   :  { %v804_v36 = vpop.f32.mrf.mxu2 }
 0x220   :  { %v805_v25 = vadd.f32 %v804_v36, %v756_v53  ;;  %v891_v60 = vpop.permute.xlu0 %890  ;;  %v901_v59 = vpop.permute.xlu1 %900 }
 0x222   :  { %v831_v40 = vmax.f32 %v805_v25, 0.0 }
 0x224   :  { %v842_v1 = vpack.c.bf16 %v831_v40, %v830_v41 }
 0x227   :  { %v807_v6 = vpop.f32.mrf.mxu2 }
 0x228   :  { %v808_v24 = vadd.f32 %v807_v6, %v759_v34  ;;  %v886_v58 = vpop.permute.xlu0 %885 }
 0x22a   :  { %v832_v31 = vmax.f32 %v808_v24, 0.0 }
 0x22f   :  { %v809_v8 = vpop.f32.mrf.mxu2 }
 0x230   :  { %v810_v18 = vadd.f32 %v809_v8, %v761_v17 }
 0x232   :  { %v833_v27 = vmax.f32 %v810_v18, 0.0 }
 0x234   :  { %v843_v54 = vpack.c.bf16 %v833_v27, %v832_v31 }
 0x237   :  { %v812_v3 = vpop.f32.mrf.mxu2 }
 0x238   :  { %v813_v26 = vadd.f32 %v812_v3, %v764_v63  ;;  %v896_v3 = vpop.permute.xlu1 %895 }
 0x23a   :  { %v834_v0 = vmax.f32 %v813_v26, 0.0 }
 0x23f   :  { %v814_v10 = vpop.f32.mrf.mxu2 }
 0x240   :  { %v815_v42 = vadd.f32 %v814_v10, %v766_v5 }
 0x242   :  { %v835_v22 = vmax.f32 %v815_v42, 0.0 }
 0x244   :  { %v844_v39 = vpack.c.bf16 %v835_v22, %v834_v0 }
 0x247   :  { %v817_v4 = vpop.f32.mrf.mxu2 }
 0x248   :  { %v818_v19 = vadd.f32 %v817_v4, %v769_v43 }
 0x24a   :  { %v836_v28 = vmax.f32 %v818_v19, 0.0 }
 0x24f   :  { %v819_v2 = vpop.f32.mrf.mxu2 }
 0x250   :  { %v820_v11 = vadd.f32 %v819_v2, %v771_v61 }
 0x252   :  { %v837_v29 = vmax.f32 %v820_v11, 0.0 }
 0x254   :  { %v845_v51 = vpack.c.bf16 %v837_v29, %v836_v28 }
 0x256   :  { %1006 = vmatpush.bf16.msra.mxu3 %v845_v51 }
 0x25a   :  { %1007 = vmatpush.bf16.msra.mxu3 %v844_v39 }
 0x25e   :  { %1008 = vmatpush.bf16.msra.mxu3 %v843_v54 }
 0x262   :  { %1009 = vmatpush.bf16.msra.mxu3 %v842_v1 }
 0x266   :  { %1010 = vmatpush.bf16.msra.mxu3 %v841_v55 }
 0x26a   :  { %1011 = vmatpush.bf16.msra.mxu3 %v840_v47  ;;  %v936_v47 = vpop.permute.xlu2 %935 }
 0x26e   :  { %1012 = vmatpush.bf16.msra.mxu3 %v1886_v32  ;;  %v1337_v32 = vld [vmem:[%s1935_s5 + $0x18] sm:$0xff] }
 0x272   :  { %1013 = vmatpush.bf16.msra.mxu3 %v1884_v49  ;;  %v1338_v49 = vld [vmem:[%s1935_s5 + $0x20] sm:$0xff]  ;;  %v911_v23 = vpop.permute.xlu2 %910 }
 0x275   :  { %1014 = vmatmul.bf16.vlgmr.msra.gmra.mxu3 %v1334_v62 }
 0x27a   :  { %v906_v48 = vpop.permute.xlu2 %905 }
 0x282   :  { %v881_v55 = vpop.permute.xlu2 %880 }
 0x285   :  { %1019 = vmatmul.bf16.gmra.mxu3 %v1335_v35 }
 0x295   :  { %1024 = vmatmul.bf16.gmra.mxu3 %v1336_v30 }
 0x2a5   :  { %1029 = vmatmul.bf16.gmra.mxu3 %v1337_v32 }
 0x2b5   :  { %1034 = vmatmul.bf16.gmra.mxu3 %v1338_v49 }
 0x2c5   :  { %1039 = vmatmul.bf16.gmra.mxu3 %v1339_v44 }
 0x2d5   :  { %1044 = vmatmul.bf16.gmra.mxu3 %v1340_v7 }
 0x2e5   :  { %1049 = vmatmul.bf16.gmra.mxu3 %v1341_v14 }
 0x2f8   :  { %v1015_v33 = vpop.f32.mrf.mxu3 }
 0x2f9   :  { %v1016_v57 = vadd.f32 %v1015_v33, %v881_v55 }
 0x2fb   :  { %v1055_v36 = vmax.f32 %v1016_v57, 0.0 }
 0x300   :  { %v1017_v21 = vpop.f32.mrf.mxu3 }
 0x301   :  { %v1018_v15 = vadd.f32 %v1017_v21, %v886_v58 }
 0x303   :  { %v1056_v56 = vmax.f32 %v1018_v15, 0.0 }
 0x305   :  { %v1071_v6 = vpack.c.bf16 %v1056_v56, %v1055_v36 }
 0x308   :  { %v1020_v8 = vpop.f32.mrf.mxu3 }
 0x309   :  { %v1021_v9 = vadd.f32 %v1020_v8, %v891_v60 }
 0x30b   :  { %v1057_v4 = vmax.f32 %v1021_v9, 0.0 }
 0x310   :  { %v1022_v10 = vpop.f32.mrf.mxu3 }
 0x311   :  { %v1023_v50 = vadd.f32 %v1022_v10, %v896_v3 }
 0x313   :  { %v1058_v16 = vmax.f32 %v1023_v50, 0.0 }
 0x315   :  { %v1072_v43 = vpack.c.bf16 %v1058_v16, %v1057_v4 }
 0x318   :  { %v1025_v5 = vpop.f32.mrf.mxu3 }
 0x319   :  { %v1026_v61 = vadd.f32 %v1025_v5, %v901_v59 }
 0x31b   :  { %v1059_v63 = vmax.f32 %v1026_v61, 0.0 }
 0x320   :  { %v1027_v19 = vpop.f32.mrf.mxu3 }
 0x321   :  { %v1028_v2 = vadd.f32 %v1027_v19, %v906_v48 }
 0x323   :  { %v1060_v42 = vmax.f32 %v1028_v2, 0.0 }
 0x325   :  { %v1073_v11 = vpack.c.bf16 %v1060_v42, %v1059_v63 }
 0x328   :  { %v1030_v17 = vpop.f32.mrf.mxu3 }
 0x329   :  { %v1031_v26 = vadd.f32 %v1030_v17, %v911_v23 }
 0x32b   :  { %v1061_v34 = vmax.f32 %v1031_v26, 0.0 }
 0x330   :  { %v1032_v28 = vpop.f32.mrf.mxu3 }
 0x331   :  { %v1033_v29 = vadd.f32 %v1032_v28, %v916_v37 }
 0x333   :  { %v1062_v18 = vmax.f32 %v1033_v29, 0.0 }
 0x335   :  { %v1074_v22 = vpack.c.bf16 %v1062_v18, %v1061_v34 }
 0x338   :  { %v1035_v51 = vpop.f32.mrf.mxu3 }
 0x339   :  { %v1036_v48 = vadd.f32 %v1035_v51, %v1921_v45 }
 0x340   :  { %v1037_v53 = vpop.f32.mrf.mxu3 }
 0x341   :  { %v1038_v14 = vadd.f32 %v1037_v53, %v926_v52 }
 0x348   :  { %v1040_v24 = vpop.f32.mrf.mxu3 }
 0x349   :  { %v1041_v44 = vadd.f32 %v1040_v24, %v931_v46 }
 0x34b   :  { %v1065_v60 = vmax.f32 %v1041_v44, 0.0 }
 0x350   :  { %v1042_v0 = vpop.f32.mrf.mxu3 }
 0x351   :  { %v1043_v30 = vadd.f32 %v1042_v0, %v936_v47  ;;  %v1342_v47 = vld [vmem:[%s1937_s7] sm:$0xff] }
 0x353   :  { %v1066_v23 = vmax.f32 %v1043_v30, 0.0 }
 0x355   :  { %v1076_v33 = vpack.c.bf16 %v1066_v23, %v1065_v60 }
 0x358   :  { %v1045_v25 = vpop.f32.mrf.mxu3 }
 0x359   :  { %v1046_v1 = vadd.f32 %v1045_v25, %v941_v13 }
 0x35b   :  { %v1067_v7 = vmax.f32 %v1046_v1, 0.0 }
 0x360   :  { %v1047_v27 = vpop.f32.mrf.mxu3 }
 0x361   :  { %v1048_v54 = vadd.f32 %v1047_v27, %v946_v38  ;;  %v1063_v38 = vmax.f32 %v1036_v48, 0.0 }
 0x363   :  { %v1068_v32 = vmax.f32 %v1048_v54, 0.0 }
 0x365   :  { %v1077_v37 = vpack.c.bf16 %v1068_v32, %v1067_v7 }
 0x368   :  { %v1050_v39 = vpop.f32.mrf.mxu3 }
 0x369   :  { %v1051_v31 = vadd.f32 %v1050_v39, %v951_v12  ;;  %v1064_v12 = vmax.f32 %v1038_v14, 0.0 }
 0x36b   :  { %v1069_v62 = vmax.f32 %v1051_v31, 0.0  ;;  %v1075_v13 = vpack.c.bf16 %v1064_v12, %v1063_v38 }
 0x370   :  { %v1052_v40 = vpop.f32.mrf.mxu3 }
 0x371   :  { %v1053_v41 = vadd.f32 %v1052_v40, %v956_v20 }
 0x373   :  { %v1070_v35 = vmax.f32 %v1053_v41, 0.0 }
 0x375   :  { %v1078_v49 = vpack.c.bf16 %v1070_v35, %v1069_v62 }
 0x377   :  { %1087 = vmatpush.bf16.msrb.mxu1 %v1078_v49 }
 0x37b   :  { %1088 = vmatpush.bf16.msrb.mxu1 %v1077_v37 }
 0x37f   :  { %1089 = vmatpush.bf16.msrb.mxu1 %v1076_v33 }
 0x383   :  { %1090 = vmatpush.bf16.msrb.mxu1 %v1075_v13 }
 0x387   :  { %1091 = vmatpush.bf16.msrb.mxu1 %v1074_v22 }
 0x38b   :  { %1092 = vmatpush.bf16.msrb.mxu1 %v1073_v11 }
 0x38f   :  { %1093 = vmatpush.bf16.msrb.mxu1 %v1072_v43 }
 0x393   :  { %1094 = vmatpush.bf16.msrb.mxu1 %v1071_v6 }
 0x396   :  { %1095 = vmatmul.bf16.vlgmr.msrb.gmra.mxu1 %v1342_v47 }
 0x413   :  { %v1096_v45 = vpop.f32.mrf.mxu1 }
 0x414   :  { %1100 = vst [vmem:[#allocation2] sm:$0x1] %v1096_v45 }
 0x415   :  { %1111 = dma.vmem_to_hbm [thread:$0]  %s1107_s1, 16, %s1109_s26, [#allocation3]  }
 0x41b   :  { %v1098_v20 = vpop.f32.mrf.mxu1 }
 0x41c   :  { %1373 = dma.done.wait [#allocation3], 16  }
 0x41d   :  { %1374 = vsyncadd [#allocation3], 4294967280 }
 0x41e   :  { %1116 = vsyncpa [#allocation3], 1 }

</bundles_post_ra>
